<compile_context>
chip_gen: v7x
topology: tpu7x:2x2x1
jax: 0.10.0
libtpu: 0.0.40
codegen_flags: <defaults>
</compile_context>

<pallas_src>
import functools

import jax
import jax.numpy as jnp
from jax.experimental import pallas as pl
from jax.experimental.pallas import tpu as pltpu


def _round_up(x, m):
    return (x + m - 1) // m * m


def _choose_tile_m(M, target):
    """Pick (TILE_M, M_pad). TILE_M is a multiple of 8; prefer a tile that divides M
    exactly (free output view, no pad compute) and >= 2 grid steps for large M so the
    parallel M axis load-balances across both TensorCores on v7x."""
    target = max(8, min(target, _round_up(M, 8)))
    if M >= 1024 and M < 2 * target:
        # Guarantee at least two grid steps on big inputs (megacore balance).
        target = max(8, _round_up((M + 1) // 2, 8))
    if M % 8 == 0:
        # Only accept an exact divisor if it is not tiny (keeps per-step overhead low).
        min_ok = max(8, (target // 4) // 8 * 8)
        for cand in range(target - target % 8, min_ok - 1, -8):
            if M % cand == 0:
                return cand, M
    tile = _round_up(min(target, M), 8)
    return tile, _round_up(M, tile)


def patch_embed_kernel(x_ref, w_ref, b_ref, o_ref):
    # MXU matmul with f32 accumulation, VPU bias add, single cast on the store.
    acc = jnp.dot(x_ref[...], w_ref[...], preferred_element_type=jnp.float32)
    o_ref[...] = (acc + b_ref[...]).astype(o_ref.dtype)


def patch_embedding(x, weight, bias, patch_size, *, tile_m=1024,
                    compute_dtype=jnp.bfloat16, out_dtype=None, input_buffers=2):
    """x: (B, Cin, H, W) NCHW (PyTorch convention).
    weight: (embed_dim, Cin, p, p), bias: (embed_dim,).
    Returns (B, H//p, W//p, embed_dim) == PyTorch forward's permute(0, 2, 3, 1)."""
    B, Cin, H, W = x.shape
    p = patch_size
    assert H % p == 0 and W % p == 0, "H and W must be divisible by patch_size"
    embed_dim = weight.shape[0]
    Hp, Wp = H // p, W // p
    M = B * Hp * Wp
    K = Cin * p * p
    N = embed_dim

    if out_dtype is None:
        out_dtype = x.dtype
    compute_isz = jnp.dtype(compute_dtype).itemsize
    out_isz = jnp.dtype(out_dtype).itemsize

    # Lane/sublane-friendly padding; TILE_M a multiple of 8, preferably dividing M.
    K_pad = _round_up(K, 128)
    N_pad = _round_up(N, 128)
    TILE_M, M_pad = _choose_tile_m(M, tile_m)

    # Patchify: cast FIRST so any materialized (M, K) intermediate is compute_dtype
    # (halves HBM traffic of the largest operand when compute_dtype=bf16).
    # K is flattened in (Cin, kh, kw) order to match Conv2d weight layout.
    xc = x.astype(compute_dtype)
    patches = xc.reshape(B, Cin, Hp, p, Wp, p)
    patches = patches.transpose(0, 2, 4, 1, 3, 5).reshape(M, K)
    if M_pad != M or K_pad != K:
        patches = jnp.pad(patches, ((0, M_pad - M), (0, K_pad - K)))

    # Parameter prep (constant-folds / hoists under jit with static weights).
    w_mat = weight.reshape(embed_dim, K).T.astype(compute_dtype)      # (K, N)
    if K_pad != K or N_pad != N:
        w_mat = jnp.pad(w_mat, ((0, K_pad - K), (0, N_pad - N)))
    b_mat = bias.astype(jnp.float32).reshape(1, N)
    if N_pad != N:
        b_mat = jnp.pad(b_mat, ((0, 0), (0, N_pad - N)))

    # VMEM budget for the actual pipeline footprint (+ headroom); keeps large tiles
    # compiling on v5e's 16 MiB default scoped limit and within v7x's 64 MiB / TC.
    vmem_need = (input_buffers * TILE_M * K_pad * compute_isz   # streamed patches tiles
                 + K_pad * N_pad * compute_isz                  # resident weight (1 buffer)
                 + 8 * N_pad * 4                                # bias (sublane-padded)
                 + 2 * TILE_M * N_pad * out_isz)                # output tiles
    vmem_limit = min(max(int(vmem_need * 1.25) + (2 << 20), 32 << 20), 64 << 20)

    bytes_accessed = (
        M_pad * K_pad * compute_isz          # patches stream
        + K_pad * N_pad * compute_isz        # weight (resident)
        + N_pad * 4                          # bias
        + M_pad * N_pad * out_isz            # output stream
    )

    # Streamed input; weight/bias stay resident (constant index_map, single buffer).
    if input_buffers != 2:
        patches_spec = pl.BlockSpec((TILE_M, K_pad), lambda i: (i, 0),
                                    pipeline_mode=pl.Buffered(input_buffers))
    else:
        patches_spec = pl.BlockSpec((TILE_M, K_pad), lambda i: (i, 0))
    weight_spec = pl.BlockSpec((K_pad, N_pad), lambda i: (0, 0),
                               pipeline_mode=pl.Buffered(1))
    bias_spec = pl.BlockSpec((1, N_pad), lambda i: (0, 0),
                             pipeline_mode=pl.Buffered(1))

    out_flat = pl.pallas_call(
        patch_embed_kernel,
        out_shape=jax.ShapeDtypeStruct((M_pad, N_pad), out_dtype),
        grid_spec=pltpu.PrefetchScalarGridSpec(
            num_scalar_prefetch=0,
            grid=(M_pad // TILE_M,),
            in_specs=[patches_spec, weight_spec, bias_spec],
            out_specs=pl.BlockSpec((TILE_M, N_pad), lambda i: (i, 0)),
        ),
        compiler_params=pltpu.CompilerParams(
            dimension_semantics=("parallel",),          # disjoint output tiles -> megacore OK
            allow_input_fusion=[True, False, False],    # let XLA fuse patchify into input DMA
            vmem_limit_bytes=vmem_limit,
        ),
        cost_estimate=pl.CostEstimate(
            flops=2 * M_pad * K_pad * N_pad,
            transcendentals=0,
            bytes_accessed=bytes_accessed,
        ),
    )(patches, w_mat, b_mat)

    if M_pad == M and N_pad == N:
        return out_flat.reshape(B, Hp, Wp, embed_dim)     # free view, no extra copy
    return out_flat[:M, :N].reshape(B, Hp, Wp, embed_dim)


if __name__ == "__main__":
    # Small shapes consistent with the module.
    B, Cin, H, W = 2, 4, 16, 16
    patch_size = 4
    embed_dim = 32

    key = jax.random.PRNGKey(0)
    kx, kw, kb = jax.random.split(key, 3)

    x = jax.random.normal(kx, (B, Cin, H, W), dtype=jnp.float32)
    # Deterministic synthetic parameters (same shapes as nn.Conv2d in __init__).
    weight = jax.random.normal(kw, (embed_dim, Cin, patch_size, patch_size),
                               dtype=jnp.float32) * 0.05
    bias = jax.random.normal(kb, (embed_dim,), dtype=jnp.float32) * 0.05

    # Reference: strided conv == patchified matmul (then NCHW -> NHWC permute).
    ref = jax.lax.conv_general_dilated(
        x, weight, window_strides=(patch_size, patch_size), padding="VALID",
        dimension_numbers=("NCHW", "OIHW", "NCHW"))
    ref = ref + bias[None, :, None, None]
    ref = jnp.transpose(ref, (0, 2, 3, 1))                # (B, Hp, Wp, embed_dim)

    # Exact f32 path (tight tolerance).
    fwd_f32 = jax.jit(functools.partial(patch_embedding, patch_size=patch_size,
                                        compute_dtype=jnp.float32))
    out_f32 = jax.block_until_ready(fwd_f32(x, weight, bias))
    assert out_f32.shape == (B, H // patch_size, W // patch_size, embed_dim)
    assert jnp.allclose(out_f32, ref, atol=1e-4, rtol=1e-4)

    # Default path: bf16-streamed operands, f32 MXU accumulation, f32 output.
    fwd = jax.jit(functools.partial(patch_embedding, patch_size=patch_size))
    out = jax.block_until_ready(fwd(x, weight, bias))
    assert out.shape == out_f32.shape and out.dtype == x.dtype
    assert jnp.allclose(out, ref, atol=5e-2, rtol=5e-2)

    print("KERNEL_OK")
</pallas_src>

<mosaic_0001>
module attributes {stable_mosaic.version = 11 : i64} {
  func.func @patch_embed_kernel(%arg0: i32, %arg1: memref<32x128xf32, #tpu.memory_space<vmem>>, %arg2: memref<128x128xf32, #tpu.memory_space<vmem>>, %arg3: memref<1x128xf32, #tpu.memory_space<vmem>>, %arg4: memref<32x128xf32, #tpu.memory_space<vmem>>) attributes {dimension_semantics = [#tpu.dimension_semantics<parallel>], iteration_bounds = array<i64: 1>, scalar_prefetch = 0 : i64, scratch_operands = 0 : i64, tpu.core_type = #tpu.core_type<tc>, window_params = [{transform_indices = @transform_0, window_bounds = array<i64: 32, 128>}, {pipeline_mode = #tpu.pipeline_mode<synchronous>, transform_indices = @transform_1, window_bounds = array<i64: 128, 128>}, {pipeline_mode = #tpu.pipeline_mode<synchronous>, transform_indices = @transform_2, window_bounds = array<i64: 1, 128>}, {transform_indices = @transform_3, window_bounds = array<i64: 32, 128>}]} {
    %c0 = arith.constant 0 : index
    %c0_0 = arith.constant 0 : index
    %0 = vector.load %arg1[%c0, %c0_0] : memref<32x128xf32, #tpu.memory_space<vmem>>, vector<32x128xf32>
    %c0_1 = arith.constant 0 : index
    %c0_2 = arith.constant 0 : index
    %1 = vector.load %arg2[%c0_1, %c0_2] : memref<128x128xf32, #tpu.memory_space<vmem>>, vector<128x128xf32>
    %cst = arith.constant dense<0.000000e+00> : vector<32x128xf32>
    %2 = tpu.matmul %0, %1, %cst {dimension_numbers = #tpu.dot_dimension_numbers<[1], [0], [0], [1], [0, 0, 1, 1], [], []>} : vector<32x128xf32>, vector<128x128xf32>, vector<32x128xf32> -> vector<32x128xf32>
    %c0_3 = arith.constant 0 : index
    %c0_4 = arith.constant 0 : index
    %3 = vector.load %arg3[%c0_3, %c0_4] : memref<1x128xf32, #tpu.memory_space<vmem>>, vector<1x128xf32>
    %4 = vector.broadcast %3 : vector<1x128xf32> to vector<32x128xf32>
    %5 = arith.addf %2, %4 : vector<32x128xf32>
    %c0_5 = arith.constant 0 : index
    %c0_6 = arith.constant 0 : index
    %6 = vector.load %arg4[%c0_5, %c0_6] : memref<32x128xf32, #tpu.memory_space<vmem>>, vector<32x128xf32>
    tpu.vector_store %arg4[%c0_5, %c0_6], %5 {strides = array<i32>} : memref<32x128xf32, #tpu.memory_space<vmem>>, vector<32x128xf32>,
    return
  }
  func.func @transform_0(%arg0: i32) -> (i32, i32) {
    %c0_i32 = arith.constant 0 : i32
    %c0_i32_0 = arith.constant 0 : i32
    return %arg0, %c0_i32 : i32, i32
  }
  func.func @transform_1(%arg0: i32) -> (i32, i32) {
    %c0_i32 = arith.constant 0 : i32
    %c0_i32_0 = arith.constant 0 : i32
    %c0_i32_1 = arith.constant 0 : i32
    return %c0_i32, %c0_i32_0 : i32, i32
  }
  func.func @transform_2(%arg0: i32) -> (i32, i32) {
    %c0_i32 = arith.constant 0 : i32
    %c0_i32_0 = arith.constant 0 : i32
    %c0_i32_1 = arith.constant 0 : i32
    return %c0_i32, %c0_i32_0 : i32, i32
  }
  func.func @transform_3(%arg0: i32) -> (i32, i32) {
    %c0_i32 = arith.constant 0 : i32
    %c0_i32_0 = arith.constant 0 : i32
    return %arg0, %c0_i32 : i32, i32
  }
}

</mosaic_0001>

<bundles_post_ra>
// kernel: patch_embedding.2
= control target key start
LH: loop header
LB: loop body
LE: loop exit
PB: predicated region body
PF: predicated region fallthrough
CT: control target
= control target key end

     0   :  { %s440_s0 = inlined_call_operand.vmem [shape: f32[128,128], index: 0, kind: input, shape index: {}]   ;;  %s441_s1 = inlined_call_operand.vmem [shape: f32[1,128], index: 1, kind: input, shape index: {}]   ;;  %s442_s2 = inlined_call_operand.vmem [shape: f32[32,64], index: 2, kind: input, shape index: {}]   ;;  %s443_s3 = inlined_call_operand.<no memory space> [shape: f32[], index: 3, kind: input, shape index: {}]   ;;  %s444_s4 = inlined_call_operand.hbm [shape: f32[32,128], index: 4, kind: output, shape index: {}]  }
   0x1   :  { %v355_v0 = vstv %s443_s3 }
   0x2   :  { %v59_v1 = vld [vmem:[%s440_s0] sm:$0xff]  ;;  %v60_v2 = vld [vmem:[%s440_s0 + $0x8] sm:$0xff]  ;;  %v61_v3 = vld [vmem:[%s440_s0 + $0x10] sm:$0xff]  ;;  %v18_v4 = vlaneseq }
   0x3   :  { %v249_v5 = vpack.c.bf16 %v60_v2, %v59_v1  ;;  %v62_v6 = vld [vmem:[%s440_s0 + $0x18] sm:$0xff]  ;;  %v63_v8 = vld [vmem:[%s440_s0 + $0x20] sm:$0xff]  ;;  %v64_v9 = vld [vmem:[%s440_s0 + $0x28] sm:$0xff] }
   0x4   :  { %v253_v7 = vpack.c.bf16 %v62_v6, %v61_v3  ;;  %v19_v10 = vand.u32 127, %v18_v4  ;;  %v257_v11 = vpack.c.bf16 %v64_v9, %v63_v8  ;;  %v17_v12 = vld [vmem:[%s442_s2] sm:$0xff]  ;;  %v188_v13 = vld [vmem:[%s442_s2 + $0x10] sm:$0xff]  ;;  %v66_v15 = vld [vmem:[%s440_s0 + $0x38] sm:$0xff] }
   0x5   :  { %250 = vmatprep.subr.bf16.mxu0 %v249_v5  ;;  %281 = vmatprep.subr.bf16.mxu1 %v249_v5  ;;  %v65_v14 = vld [vmem:[%s440_s0 + $0x30] sm:$0xff] }
   0x6   :  { %252 = vmatpush3.bf16.msra.mxu0 %v249_v5  ;;  %289 = vmatpush3.bf16.msra.mxu1 %v249_v5  ;;  %vm21_vm0 = vcmp.lt.s32.totalorder %v19_v10, 64 }
   0x7   :  { %254 = vmatprep.subr.bf16.mxu0 %v253_v7  ;;  %282 = vmatprep.subr.bf16.mxu1 %v253_v7  ;;  %v22_v16 = vsel %vm21_vm0, %v17_v12, %v355_v0  ;;  %v41_v17 = vsel %vm21_vm0, %v188_v13, %v355_v0 }
   0x8   :  { %10 = vsyncpa [#allocation8], 0  ;;  %243 = vmatprep.mubr.f32.mxu0 %v22_v16  ;;  %246 = vmatprep.mubr.f32.mxu1 %v41_v17  ;;  %v261_v18 = vpack.c.bf16 %v66_v15, %v65_v14  ;;  %v67_v19 = vld [vmem:[%s440_s0 + $0x40] sm:$0xff]  ;;  %v68_v20 = vld [vmem:[%s440_s0 + $0x48] sm:$0xff]  ;;  %s324_s30 = smov [#allocation7]  }
   0x9   :  { %v265_v21 = vpack.c.bf16 %v68_v20, %v67_v19  ;;  %v69_v22 = vld [vmem:[%s440_s0 + $0x50] sm:$0xff]  ;;  %v70_v23 = vld [vmem:[%s440_s0 + $0x58] sm:$0xff]  ;;  %v71_v25 = vld [vmem:[%s440_s0 + $0x60] sm:$0xff]  ;;  %s176_s5 = sshll.u32 %s324_s30, 4  ;;  %s177_s5 = int_to_ptr.vmem [resolvable:$true] %s176_s5 }
   0xa   :  { %256 = vmatpush3.bf16.msra.mxu0 %v253_v7  ;;  %290 = vmatpush3.bf16.msra.mxu1 %v253_v7  ;;  %v269_v24 = vpack.c.bf16 %v70_v23, %v69_v22  ;;  %v72_v26 = vld [vmem:[%s440_s0 + $0x68] sm:$0xff]  ;;  %v73_v28 = vld [vmem:[%s440_s0 + $0x70] sm:$0xff]  ;;  %v74_v29 = vld [vmem:[%s440_s0 + $0x78] sm:$0xff]  ;;  %p305_p1 = scmp.lt.s32.totalorder %s177_s5, %s177_s5 }
   0xb   :  { %258 = vmatprep.subr.bf16.mxu0 %v257_v11  ;;  %283 = vmatprep.subr.bf16.mxu1 %v257_v11  ;;  %v273_v27 = vpack.c.bf16 %v72_v26, %v71_v25  ;;  %v277_v30 = vpack.c.bf16 %v74_v29, %v73_v28  ;;  %v187_v31 = vld [vmem:[%s442_s2 + $0x8] sm:$0xff]  ;;  %v189_v32 = vld [vmem:[%s442_s2 + $0x18] sm:$0xff]  ;;  %v190_v35 = vld [vmem:[%s441_s1] ss:$0 sm:$0xff]  ;;  %s300_s2 = scalar_lea.vmem %s177_s5, 512 }
   0xc   :  { %v31_v33 = vsel %vm21_vm0, %v187_v31, %v355_v0  ;;  %v51_v34 = vsel %vm21_vm0, %v189_v32, %v355_v0  ;;  %p301_p0 = scmp.ne.s32.totalorder %s177_s5, %s300_s2  ;;  %p306_p2 = scmp.lt.s32.totalorder %s300_s2, %s300_s2 }
   0xe   :  { %260 = vmatpush3.bf16.msra.mxu0 %v257_v11  ;;  %291 = vmatpush3.bf16.msra.mxu1 %v257_v11  ;;  %p307_p3 = por %p306_p2, %p305_p1 }
   0xf   :  { %262 = vmatprep.subr.bf16.mxu0 %v261_v18  ;;  %284 = vmatprep.subr.bf16.mxu1 %v261_v18 }
  0x10   :  { %p308_p4 = pnand %p307_p3, %p301_p0 }
  0x12   :  { %264 = vmatpush3.bf16.msra.mxu0 %v261_v18  ;;  %292 = vmatpush3.bf16.msra.mxu1 %v261_v18 }
  0x13   :  { %266 = vmatprep.subr.bf16.mxu0 %v265_v21  ;;  %285 = vmatprep.subr.bf16.mxu1 %v265_v21 }
  0x16   :  { %268 = vmatpush3.bf16.msra.mxu0 %v265_v21  ;;  %293 = vmatpush3.bf16.msra.mxu1 %v265_v21 }
  0x17   :  { %270 = vmatprep.subr.bf16.mxu0 %v269_v24  ;;  %286 = vmatprep.subr.bf16.mxu1 %v269_v24 }
  0x1a   :  { %272 = vmatpush3.bf16.msra.mxu0 %v269_v24  ;;  %294 = vmatpush3.bf16.msra.mxu1 %v269_v24 }
  0x1b   :  { %274 = vmatprep.subr.bf16.mxu0 %v273_v27  ;;  %287 = vmatprep.subr.bf16.mxu1 %v273_v27 }
  0x1e   :  { %276 = vmatpush3.bf16.msra.mxu0 %v273_v27  ;;  %295 = vmatpush3.bf16.msra.mxu1 %v273_v27 }
  0x1f   :  { %278 = vmatprep.subr.bf16.mxu0 %v277_v30  ;;  %288 = vmatprep.subr.bf16.mxu1 %v277_v30 }
  0x22   :  { %280 = vmatpush3.bf16.msra.mxu0 %v277_v30  ;;  %296 = vmatpush3.bf16.msra.mxu1 %v277_v30 }
  0x25   :  { %244 = vmatmul.mubr.f32.vlgmr.msra.gmra.mrb[0].mxu0 %v31_v33  ;;  %247 = vmatmul.mubr.f32.vlgmr.msra.gmra.mrb[0].mxu1 %v51_v34 }
  0xf8   :  { %v245_v36 = vpop.f32.mrb[0].mxu0  ;;  %v248_v37 = vpop.f32.mrb[0].mxu1 }
  0xf9   :  { %v154_v38 = vadd.f32 %v245_v36, %v190_v35  ;;  %v164_v39 = vadd.f32 %v248_v37, %v190_v35  ;;  %v148_v40 = vpop.f32.mrb[1].mxu0  ;;  %v158_v41 = vpop.f32.mrb[1].mxu1 }
  0xfa   :  { %v149_v42 = vadd.f32 %v190_v35, %v148_v40  ;;  %v159_v43 = vadd.f32 %v190_v35, %v158_v41 }
  0xfb   :  { %168 = vst [vmem:[#allocation7 + $0x8] sm:$0xff] %v154_v38  ;;  %170 = vst [vmem:[#allocation7 + $0x18] sm:$0xff] %v164_v39 }
  0xfc   :  { %167 = vst [vmem:[#allocation7] sm:$0xff] %v149_v42  ;;  %169 = vst [vmem:[#allocation7 + $0x10] sm:$0xff] %v159_v43 }
  0xfd   :  { %311 = shalt.err (!%p308_p4)
}
  0xfe   :  { %s312_s7 = scalar_lea.hbm %s444_s4, 512 }
  0xff   :  { %p313_p5 = scmp.ne.s32.totalorder %s444_s4, %s312_s7  ;;  %p316_p6 = scmp.lt.u32.totalorder %s312_s7, %s444_s4 }
 0x101   :  { %p318_p7 = pnand %p316_p6, %p313_p5 }
 0x103   :  { %321 = shalt.err (!%p318_p7)
}
 0x104   :  { %s325_s12 = smov 128   ;;  %s326_s13 = smov 8  }
 0x105   :  { %182 = dma.vmem_to_hbm [thread:$0]  %s177_s5, 512, %s444_s4, [#allocation8], %s325_s12, %s325_s12, %s326_s13  }
 0x106   :  { %322 = dma.done.wait [#allocation8], 512  }
 0x107   :  { %323 = vsyncadd [#allocation8], 4294966784 }
 0x108   :  { %186 = vsyncpa [#allocation8], 1 }

</bundles_post_ra>
